<compile_context>
chip_gen: v5e
topology: v5e:2x2
jax: 0.10.0
libtpu: 0.0.40
codegen_flags: <defaults>
</compile_context>

<pallas_src>
import functools

import jax
import jax.numpy as jnp
from jax.experimental import pallas as pl
from jax.experimental.pallas import tpu as pltpu

# Hyperparameters matching CapsLoss / MarginLoss / ReconstructionLoss defaults.
M_PLUS = 0.9
M_MINUS = 0.1
MARGIN_LOSS_LAMBDA = 0.5
RECONSTRUCTION_LOSS_LAMBDA = 0.0005
BATCH_AVERAGED = True

_LANE = 128
_SUBLANE = 8


def _round_up(x, m):
    return ((x + m - 1) // m) * m


def _vmem_bytes_per_row(x):
    """VMEM bytes one batch-row of `x` occupies once (8,128)-tile padded."""
    dims = list(x.shape[1:]) or [1]
    itemsize = x.dtype.itemsize
    if len(dims) == 1:
        return _round_up(dims[0], _LANE) * itemsize
    lead = 1
    for d in dims[:-2]:
        lead *= d
    return lead * _round_up(dims[-2], _SUBLANE) * _round_up(dims[-1], _LANE) * itemsize


def _tpu_vmem_budget():
    """Generation-aware tile budget + consistent scoped-VMEM limit."""
    try:
        cap = pltpu.get_tpu_info().vmem_capacity_bytes
    except Exception:
        cap = 64 * 1024 * 1024  # conservative: v7x per-TensorCore VMEM
    budget = min(24 * 1024 * 1024, cap // 3)
    limit = min(48 * 1024 * 1024, (cap * 3) // 4)
    return budget, limit


def _batch_tiling(batch, bytes_per_row, budget):
    """Pick tile rows (2x for input double-buffering) and the grid split."""
    tm = budget // max(2 * bytes_per_row, 1)
    tm = max(_SUBLANE, (tm // _SUBLANE) * _SUBLANE)
    if tm >= batch:
        tm, n_tiles = batch, 1                 # single exact full-batch tile
    else:
        n_tiles = -(-batch // tm)
    tail = batch - (n_tiles - 1) * tm
    tail = 0 if tail == tm else tail           # 0 => no ragged tail tile
    ncores = 2 if n_tiles >= 2 else 1          # v7x: 2 TCs; harmless elsewhere
    inner = -(-n_tiles // ncores)
    return tm, n_tiles, tail, ncores, inner


def _prep_targets(targets, batch):
    """Return (target array for the kernel, targets_are_labels flag)."""
    if targets.ndim == 1:
        return targets.astype(jnp.int32).reshape(batch, 1), True
    # One-hot (or soft) targets are used verbatim, exactly like the reference.
    return targets, False


def _margin_per_elem(act_f32, tgt, targets_are_labels, m_plus, m_minus, lam):
    pos = jnp.maximum(m_plus - act_f32, 0.0)
    neg = jnp.maximum(act_f32 - m_minus, 0.0)
    if targets_are_labels:
        cls = jax.lax.broadcasted_iota(jnp.int32, act_f32.shape, 1)
        is_target = cls == tgt                       # (n,1) int32 broadcast
        return jnp.where(is_target, pos * pos, lam * (neg * neg))
    t_k = tgt.astype(jnp.float32)                    # one-hot / soft weights
    return t_k * (pos * pos) + (1.0 - t_k) * lam * (neg * neg)


# ------------------------- Fused CapsLoss kernel ----------------------------


def _caps_loss_kernel(act_ref, tgt_ref, rec_ref, orig_ref, m_ref, r_ref, *,
                      tile_rows, tail_rows, inner_steps, total_rows,
                      targets_are_labels, m_plus, m_minus, margin_lambda):
    core = pl.program_id(0)
    step = pl.program_id(1)

    @pl.when(step == 0)
    def _init():
        m_ref[...] = jnp.zeros_like(m_ref)
        r_ref[...] = jnp.zeros_like(r_ref)

    start = (core * inner_steps + step) * tile_rows
    lane = r_ref.shape[-1]

    def _accumulate(nrows):
        # Margin term (tiny; fully hidden under the image DMA).
        act = act_ref[0:nrows, :].astype(jnp.float32)
        per_elem = _margin_per_elem(act, tgt_ref[0:nrows, :], targets_are_labels,
                                    m_plus, m_minus, margin_lambda)
        m_ref[...] += jnp.sum(per_elem, keepdims=True)[None]

        # Reconstruction term: native-dtype blocks upcast in-register; reduce
        # only the leading dims (pure VPU adds) keeping lane partials resident.
        diff = (rec_ref[0:nrows].astype(jnp.float32)
                - orig_ref[0:nrows].astype(jnp.float32))
        sq = diff * diff
        partial = jnp.sum(sq, axis=tuple(range(sq.ndim - 1)))
        r_ref[...] += partial.reshape(1, 1, lane)

    @pl.when(start + tile_rows <= total_rows)        # complete tile
    def _full():
        _accumulate(tile_rows)

    if tail_rows:                                    # ragged tail (static size)
        @pl.when(jnp.logical_and(start < total_rows,
                                 start + tile_rows > total_rows))
        def _tail():
            _accumulate(tail_rows)


def _fused_sums(act, targets, orig, rec, margin_lambda, m_plus, m_minus,
                vmem_budget_bytes=None):
    b, nc = act.shape
    assert rec.ndim >= 2 and rec.shape == orig.shape and rec.shape[0] == b

    tgt, targets_are_labels = _prep_targets(targets, b)
    budget, vmem_limit = _tpu_vmem_budget()
    if vmem_budget_bytes is not None:
        budget = vmem_budget_bytes

    row_bytes = (_vmem_bytes_per_row(rec) + _vmem_bytes_per_row(orig)
                 + _vmem_bytes_per_row(act) + _vmem_bytes_per_row(tgt))
    tm, n_tiles, tail, ncores, inner = _batch_tiling(b, row_bytes, budget)

    if n_tiles > 1:
        # Only the tiny activation / target arrays are padded; the big image
        # tensors are DMA'd in their native layout (ragged tail in-kernel).
        pad_rows = n_tiles * tm
        act_k = jnp.pad(act, ((0, pad_rows - b), (0, 0)))
        tgt_k = jnp.pad(tgt, ((0, pad_rows - b), (0, 0)))
    else:
        act_k, tgt_k = act, tgt

    rest = rec.shape[1:]
    zeros_rest = (0,) * len(rest)
    lane = rest[-1]
    last_tile = n_tiles - 1

    def tile_index(c, i):
        # Clamp duplicate steps (odd tile count split over 2 cores) to a valid
        # block; their contribution is skipped in-kernel (start >= total_rows).
        return jnp.minimum(c * inner + i, last_tile)

    m_part, r_part = pl.pallas_call(
        functools.partial(_caps_loss_kernel, tile_rows=tm, tail_rows=tail,
                          inner_steps=inner, total_rows=b,
                          targets_are_labels=targets_are_labels,
                          m_plus=m_plus, m_minus=m_minus,
                          margin_lambda=margin_lambda),
        out_shape=(jax.ShapeDtypeStruct((ncores, 1, 1), jnp.float32),
                   jax.ShapeDtypeStruct((ncores, 1, lane), jnp.float32)),
        grid_spec=pltpu.PrefetchScalarGridSpec(
            num_scalar_prefetch=0,
            grid=(ncores, inner),
            in_specs=[
                pl.BlockSpec((tm, nc), lambda c, i: (tile_index(c, i), 0)),
                pl.BlockSpec((tm, tgt_k.shape[1]),
                             lambda c, i: (tile_index(c, i), 0)),
                pl.BlockSpec((tm,) + rest,
                             lambda c, i: (tile_index(c, i),) + zeros_rest),
                pl.BlockSpec((tm,) + rest,
                             lambda c, i: (tile_index(c, i),) + zeros_rest),
            ],
            out_specs=[
                pl.BlockSpec((1, 1, 1), lambda c, i: (c, 0, 0)),
                pl.BlockSpec((1, 1, lane), lambda c, i: (c, 0, 0)),
            ]),
        compiler_params=pltpu.CompilerParams(
            dimension_semantics=("parallel", "arbitrary"),
            vmem_limit_bytes=vmem_limit),
    )(act_k, tgt_k, rec, orig)

    return jnp.sum(m_part), jnp.sum(r_part), b


# -------------------------- Margin-loss-only kernel --------------------------


def _margin_only_kernel(act_ref, tgt_ref, m_ref, *, tile_rows, tail_rows,
                        total_rows, targets_are_labels, m_plus, m_minus,
                        margin_lambda):
    step = pl.program_id(0)

    @pl.when(step == 0)
    def _init():
        m_ref[...] = jnp.zeros_like(m_ref)

    start = step * tile_rows

    def _accumulate(nrows):
        act = act_ref[0:nrows, :].astype(jnp.float32)
        per_elem = _margin_per_elem(act, tgt_ref[0:nrows, :], targets_are_labels,
                                    m_plus, m_minus, margin_lambda)
        m_ref[...] += jnp.sum(per_elem, keepdims=True)

    @pl.when(start + tile_rows <= total_rows)
    def _full():
        _accumulate(tile_rows)

    if tail_rows:
        @pl.when(start + tile_rows > total_rows)
        def _tail():
            _accumulate(tail_rows)


def margin_loss(class_caps_activations, targets, *, batch_averaged=BATCH_AVERAGED,
                margin_loss_lambda=MARGIN_LOSS_LAMBDA, m_plus=M_PLUS,
                m_minus=M_MINUS):
    act = class_caps_activations
    b, nc = act.shape
    tgt, targets_are_labels = _prep_targets(targets, b)

    budget, vmem_limit = _tpu_vmem_budget()
    row_bytes = _vmem_bytes_per_row(act) + _vmem_bytes_per_row(tgt)
    tm, n_tiles, tail, _, _ = _batch_tiling(b, row_bytes, budget)

    if n_tiles > 1:
        pad_rows = n_tiles * tm
        act = jnp.pad(act, ((0, pad_rows - b), (0, 0)))
        tgt = jnp.pad(tgt, ((0, pad_rows - b), (0, 0)))

    total = pl.pallas_call(
        functools.partial(_margin_only_kernel, tile_rows=tm, tail_rows=tail,
                          total_rows=b, targets_are_labels=targets_are_labels,
                          m_plus=m_plus, m_minus=m_minus,
                          margin_lambda=margin_loss_lambda),
        out_shape=jax.ShapeDtypeStruct((1, 1), jnp.float32),
        grid_spec=pltpu.PrefetchScalarGridSpec(
            num_scalar_prefetch=0,
            grid=(n_tiles,),
            in_specs=[pl.BlockSpec((tm, nc), lambda i: (i, 0)),
                      pl.BlockSpec((tm, tgt.shape[1]), lambda i: (i, 0))],
            out_specs=pl.BlockSpec((1, 1), lambda i: (0, 0))),
        compiler_params=pltpu.CompilerParams(
            dimension_semantics=("arbitrary",), vmem_limit_bytes=vmem_limit),
    )(act, tgt)[0, 0]

    return total / b if batch_averaged else total


# ---------------------- Reconstruction-loss-only kernel ----------------------


def _recon_only_kernel(rec_ref, orig_ref, r_ref, *, tile_rows, tail_rows,
                       inner_steps, total_rows):
    core = pl.program_id(0)
    step = pl.program_id(1)

    @pl.when(step == 0)
    def _init():
        r_ref[...] = jnp.zeros_like(r_ref)

    start = (core * inner_steps + step) * tile_rows
    lane = r_ref.shape[-1]

    def _accumulate(nrows):
        diff = (rec_ref[0:nrows].astype(jnp.float32)
                - orig_ref[0:nrows].astype(jnp.float32))
        sq = diff * diff
        partial = jnp.sum(sq, axis=tuple(range(sq.ndim - 1)))
        r_ref[...] += partial.reshape(1, 1, lane)

    @pl.when(start + tile_rows <= total_rows)
    def _full():
        _accumulate(tile_rows)

    if tail_rows:
        @pl.when(jnp.logical_and(start < total_rows,
                                 start + tile_rows > total_rows))
        def _tail():
            _accumulate(tail_rows)


def reconstruction_loss(reconstructed_inputs, original_inputs, *,
                        batch_averaged=BATCH_AVERAGED, vmem_budget_bytes=None):
    rec, orig = reconstructed_inputs, original_inputs
    assert rec.ndim >= 2 and rec.shape == orig.shape
    b = rec.shape[0]

    budget, vmem_limit = _tpu_vmem_budget()
    if vmem_budget_bytes is not None:
        budget = vmem_budget_bytes
    row_bytes = _vmem_bytes_per_row(rec) + _vmem_bytes_per_row(orig)
    tm, n_tiles, tail, ncores, inner = _batch_tiling(b, row_bytes, budget)

    rest = rec.shape[1:]
    zeros_rest = (0,) * len(rest)
    lane = rest[-1]
    last_tile = n_tiles - 1

    def tile_index(c, i):
        return jnp.minimum(c * inner + i, last_tile)

    r_part = pl.pallas_call(
        functools.partial(_recon_only_kernel, tile_rows=tm, tail_rows=tail,
                          inner_steps=inner, total_rows=b),
        out_shape=jax.ShapeDtypeStruct((ncores, 1, lane), jnp.float32),
        grid_spec=pltpu.PrefetchScalarGridSpec(
            num_scalar_prefetch=0,
            grid=(ncores, inner),
            in_specs=[
                pl.BlockSpec((tm,) + rest,
                             lambda c, i: (tile_index(c, i),) + zeros_rest),
                pl.BlockSpec((tm,) + rest,
                             lambda c, i: (tile_index(c, i),) + zeros_rest),
            ],
            out_specs=pl.BlockSpec((1, 1, lane), lambda c, i: (c, 0, 0))),
        compiler_params=pltpu.CompilerParams(
            dimension_semantics=("parallel", "arbitrary"),
            vmem_limit_bytes=vmem_limit),
    )(rec, orig)

    total = jnp.sum(r_part)
    return total / b if batch_averaged else total


# --------------------------------- CapsLoss ----------------------------------


def caps_loss(class_caps_activations, targets, original_inputs=None,
              reconstructed_inputs=None, *,
              reconstruction_loss_lambda=RECONSTRUCTION_LOSS_LAMBDA,
              batch_averaged=BATCH_AVERAGED,
              margin_loss_lambda=MARGIN_LOSS_LAMBDA,
              m_plus=M_PLUS, m_minus=M_MINUS, vmem_budget_bytes=None):
    """Mirrors CapsLoss.forward: margin loss alone, or (tot, margin, recon)."""
    if reconstructed_inputs is None:
        return margin_loss(class_caps_activations, targets,
                           batch_averaged=batch_averaged,
                           margin_loss_lambda=margin_loss_lambda,
                           m_plus=m_plus, m_minus=m_minus)

    m_sum, r_sum, b = _fused_sums(class_caps_activations, targets,
                                  original_inputs, reconstructed_inputs,
                                  margin_loss_lambda, m_plus, m_minus,
                                  vmem_budget_bytes)
    if batch_averaged:
        m, r = m_sum / b, r_sum / b
    else:
        m, r = m_sum, r_sum
    return m + reconstruction_loss_lambda * r, m, r


# ---------------------------- Pure-JAX references ----------------------------


def _margin_loss_ref(act, targets):
    act = act.astype(jnp.float32)
    if targets.ndim == 1:
        t_k = jax.nn.one_hot(targets, act.shape[1], dtype=jnp.float32)
    else:
        t_k = targets.astype(jnp.float32)
    correct = t_k * jnp.maximum(0.0, M_PLUS - act) ** 2
    incorrect = (1.0 - t_k) * MARGIN_LOSS_LAMBDA * jnp.maximum(0.0, act - M_MINUS) ** 2
    loss = jnp.sum(correct + incorrect, axis=-1)
    return jnp.mean(loss) if BATCH_AVERAGED else jnp.sum(loss)


def _recon_loss_ref(rec, orig):
    b = rec.shape[0]
    d = (rec.reshape(b, -1).astype(jnp.float32)
         - orig.reshape(b, -1).astype(jnp.float32))
    loss = jnp.sum(d * d, axis=-1)
    return jnp.mean(loss) if BATCH_AVERAGED else jnp.sum(loss)


if __name__ == "__main__":
    key = jax.random.PRNGKey(0)
    ks = jax.random.split(key, 10)

    # Shapes per the module spec: activations [b, B], images [b, C, H, W].
    batch, num_classes = 8, 10
    channels, ih, iw = 1, 16, 16

    act = jax.random.uniform(ks[0], (batch, num_classes), dtype=jnp.float32)
    labels = jax.random.randint(ks[1], (batch,), 0, num_classes)
    targets_onehot = jax.nn.one_hot(labels, num_classes, dtype=jnp.float32)
    original = jax.random.uniform(ks[2], (batch, channels, ih, iw), dtype=jnp.float32)
    reconstructed = jax.random.uniform(ks[3], (batch, channels, ih, iw), dtype=jnp.float32)

    # Full fused CapsLoss path (margin + reconstruction), one-hot targets.
    tot, m, r = caps_loss(act, targets_onehot, original, reconstructed)
    tot = jax.block_until_ready(tot)
    ref_m = _margin_loss_ref(act, targets_onehot)
    ref_r = _recon_loss_ref(reconstructed, original)
    ref_tot = ref_m + RECONSTRUCTION_LOSS_LAMBDA * ref_r
    assert jnp.allclose(m, ref_m, rtol=1e-5, atol=1e-6), (m, ref_m)
    assert jnp.allclose(r, ref_r, rtol=1e-5, atol=1e-6), (r, ref_r)
    assert jnp.allclose(tot, ref_tot, rtol=1e-5, atol=1e-6), (tot, ref_tot)

    # Standalone reconstruction loss path.
    r_only = jax.block_until_ready(reconstruction_loss(reconstructed, original))
    assert jnp.allclose(r_only, ref_r, rtol=1e-5, atol=1e-6), (r_only, ref_r)

    # Margin-only path, integer labels, non-multiple-of-8 batch.
    b2 = 5
    act2 = jax.random.uniform(ks[4], (b2, num_classes), dtype=jnp.float32)
    labels2 = jax.random.randint(ks[5], (b2,), 0, num_classes)
    m2 = jax.block_until_ready(caps_loss(act2, labels2))
    ref_m2 = _margin_loss_ref(act2, labels2)
    assert jnp.allclose(m2, ref_m2, rtol=1e-5, atol=1e-6), (m2, ref_m2)

    # Multi-tile + 2-way core split + ragged-tail path with bf16 images
    # (forced tiny VMEM budget so the grid machinery is actually exercised).
    b3, c3 = 37, 3
    act3 = jax.random.uniform(ks[6], (b3, num_classes), dtype=jnp.float32)
    labels3 = jax.random.randint(ks[7], (b3,), 0, num_classes)
    orig3 = jax.random.uniform(ks[8], (b3, c3, ih, iw)).astype(jnp.bfloat16)
    rec3 = jax.random.uniform(ks[9], (b3, c3, ih, iw)).astype(jnp.bfloat16)
    tot3, m3, r3 = caps_loss(act3, labels3, orig3, rec3,
                             vmem_budget_bytes=256 * 1024)
    tot3 = jax.block_until_ready(tot3)
    ref_m3 = _margin_loss_ref(act3, labels3)
    ref_r3 = _recon_loss_ref(rec3, orig3)
    ref_tot3 = ref_m3 + RECONSTRUCTION_LOSS_LAMBDA * ref_r3
    assert jnp.allclose(m3, ref_m3, rtol=1e-4, atol=1e-5), (m3, ref_m3)
    assert jnp.allclose(r3, ref_r3, rtol=1e-4, atol=1e-4), (r3, ref_r3)
    assert jnp.allclose(tot3, ref_tot3, rtol=1e-4, atol=1e-4), (tot3, ref_tot3)

    print("KERNEL_OK")
</pallas_src>

<mosaic_0001>
module attributes {stable_mosaic.version = 11 : i64} {
  func.func @_caps_loss_kernel(%arg0: i32, %arg1: i32, %arg2: memref<8x10xf32, #tpu.memory_space<vmem>>, %arg3: memref<8x10xf32, #tpu.memory_space<vmem>>, %arg4: memref<8x1x16x16xf32, #tpu.memory_space<vmem>>, %arg5: memref<8x1x16x16xf32, #tpu.memory_space<vmem>>, %arg6: memref<1x1x1xf32, #tpu.memory_space<vmem>>, %arg7: memref<1x1x16xf32, #tpu.memory_space<vmem>>) attributes {dimension_semantics = [#tpu.dimension_semantics<parallel>, #tpu.dimension_semantics<arbitrary>], iteration_bounds = array<i64: 1, 1>, scalar_prefetch = 0 : i64, scratch_operands = 0 : i64, tpu.core_type = #tpu.core_type<tc>, window_params = [{transform_indices = @transform_0, window_bounds = array<i64: 8, 10>}, {transform_indices = @transform_1, window_bounds = array<i64: 8, 10>}, {transform_indices = @transform_2, window_bounds = array<i64: 8, 1, 16, 16>}, {transform_indices = @transform_3, window_bounds = array<i64: 8, 1, 16, 16>}, {transform_indices = @transform_4, window_bounds = array<i64: 1, 1, 1>}, {transform_indices = @transform_5, window_bounds = array<i64: 1, 1, 16>}]} {
    %c0_i32 = arith.constant 0 : i32
    %0 = arith.cmpi eq, %arg1, %c0_i32 : i32
    %1 = arith.extui %0 : i1 to i32
    %c0_i32_0 = arith.constant 0 : i32
    %2 = arith.cmpi ne, %1, %c0_i32_0 : i32
    scf.if %2 {
      %cst = arith.constant 0.000000e+00 : f32
      %10 = vector.broadcast %cst : f32 to vector<1x1x1xf32>
      %c0 = arith.constant 0 : index
      %c0_4 = arith.constant 0 : index
      %c0_5 = arith.constant 0 : index
      %11 = vector.load %arg6[%c0, %c0_4, %c0_5] : memref<1x1x1xf32, #tpu.memory_space<vmem>>, vector<1x1x1xf32>
      tpu.vector_store %arg6[%c0, %c0_4, %c0_5], %10 {strides = array<i32>} : memref<1x1x1xf32, #tpu.memory_space<vmem>>, vector<1x1x1xf32>,
      %cst_6 = arith.constant 0.000000e+00 : f32
      %12 = vector.broadcast %cst_6 : f32 to vector<1x1x16xf32>
      %c0_7 = arith.constant 0 : index
      %c0_8 = arith.constant 0 : index
      %c0_9 = arith.constant 0 : index
      %13 = vector.load %arg7[%c0_7, %c0_8, %c0_9] : memref<1x1x16xf32, #tpu.memory_space<vmem>>, vector<1x1x16xf32>
      tpu.vector_store %arg7[%c0_7, %c0_8, %c0_9], %12 {strides = array<i32>} : memref<1x1x16xf32, #tpu.memory_space<vmem>>, vector<1x1x16xf32>,
    } else {
    }
    %c1_i32 = arith.constant 1 : i32
    %3 = arith.muli %arg0, %c1_i32 : i32
    %4 = arith.addi %3, %arg1 : i32
    %c8_i32 = arith.constant 8 : i32
    %5 = arith.muli %4, %c8_i32 : i32
    %c8_i32_1 = arith.constant 8 : i32
    %6 = arith.addi %5, %c8_i32_1 : i32
    %c8_i32_2 = arith.constant 8 : i32
    %7 = arith.cmpi sle, %6, %c8_i32_2 : i32
    %8 = arith.extui %7 : i1 to i32
    %c0_i32_3 = arith.constant 0 : i32
    %9 = arith.cmpi ne, %8, %c0_i32_3 : i32
    scf.if %9 {
      %c0 = arith.constant 0 : index
      %c0_4 = arith.constant 0 : index
      %10 = vector.load %arg2[%c0, %c0_4] : memref<8x10xf32, #tpu.memory_space<vmem>>, vector<8x10xf32>
      %c0_5 = arith.constant 0 : index
      %c0_6 = arith.constant 0 : index
      %11 = vector.load %arg3[%c0_5, %c0_6] : memref<8x10xf32, #tpu.memory_space<vmem>>, vector<8x10xf32>
      %cst = arith.constant 0.899999976 : f32
      %12 = vector.broadcast %cst : f32 to vector<8x10xf32>
      %13 = arith.subf %12, %10 : vector<8x10xf32>
      %cst_7 = arith.constant 0.000000e+00 : f32
      %14 = vector.broadcast %cst_7 : f32 to vector<8x10xf32>
      %15 = arith.maximumf %13, %14 : vector<8x10xf32>
      %cst_8 = arith.constant 1.000000e-01 : f32
      %16 = vector.broadcast %cst_8 : f32 to vector<8x10xf32>
      %17 = arith.subf %10, %16 : vector<8x10xf32>
      %cst_9 = arith.constant 0.000000e+00 : f32
      %18 = vector.broadcast %cst_9 : f32 to vector<8x10xf32>
      %19 = arith.maximumf %17, %18 : vector<8x10xf32>
      %20 = arith.mulf %15, %15 : vector<8x10xf32>
      %21 = arith.mulf %11, %20 : vector<8x10xf32>
      %cst_10 = arith.constant 1.000000e+00 : f32
      %22 = vector.broadcast %cst_10 : f32 to vector<8x10xf32>
      %23 = arith.subf %22, %11 : vector<8x10xf32>
      %cst_11 = arith.constant 5.000000e-01 : f32
      %24 = vector.broadcast %cst_11 : f32 to vector<8x10xf32>
      %25 = arith.mulf %23, %24 : vector<8x10xf32>
      %26 = arith.mulf %19, %19 : vector<8x10xf32>
      %27 = arith.mulf %25, %26 : vector<8x10xf32>
      %28 = arith.addf %21, %27 : vector<8x10xf32>
      %c0_12 = arith.constant 0 : index
      %c0_13 = arith.constant 0 : index
      %c0_14 = arith.constant 0 : index
      %29 = vector.load %arg6[%c0_12, %c0_13, %c0_14] : memref<1x1x1xf32, #tpu.memory_space<vmem>>, vector<1x1x1xf32>
      %30 = vector.shape_cast %28 : vector<8x10xf32> to vector<1x8x10xf32>
      %cst_15 = arith.constant dense<0.000000e+00> : vector<1xf32>
      %31 = vector.multi_reduction <add>, %30, %cst_15 [1, 2] : vector<1x8x10xf32> to vector<1xf32>
      %32 = vector.shape_cast %31 : vector<1xf32> to vector<1x1x1xf32>
      %33 = vector.extract %32[0, 0, 0] : f32 from vector<1x1x1xf32>
      %34 = vector.broadcast %33 : f32 to vector<1x1xf32>
      %35 = vector.shape_cast %34 : vector<1x1xf32> to vector<1x1x1xf32>
      %36 = arith.addf %29, %35 : vector<1x1x1xf32>
      %c0_16 = arith.constant 0 : index
      %c0_17 = arith.constant 0 : index
      %c0_18 = arith.constant 0 : index
      %37 = vector.load %arg6[%c0_16, %c0_17, %c0_18] : memref<1x1x1xf32, #tpu.memory_space<vmem>>, vector<1x1x1xf32>
      tpu.vector_store %arg6[%c0_16, %c0_17, %c0_18], %36 {strides = array<i32>} : memref<1x1x1xf32, #tpu.memory_space<vmem>>, vector<1x1x1xf32>,
      %c0_19 = arith.constant 0 : index
      %c0_20 = arith.constant 0 : index
      %c0_21 = arith.constant 0 : index
      %c0_22 = arith.constant 0 : index
      %38 = vector.load %arg4[%c0_19, %c0_20, %c0_21, %c0_22] : memref<8x1x16x16xf32, #tpu.memory_space<vmem>>, vector<8x1x16x16xf32>
      %c0_23 = arith.constant 0 : index
      %c0_24 = arith.constant 0 : index
      %c0_25 = arith.constant 0 : index
      %c0_26 = arith.constant 0 : index
      %39 = vector.load %arg5[%c0_23, %c0_24, %c0_25, %c0_26] : memref<8x1x16x16xf32, #tpu.memory_space<vmem>>, vector<8x1x16x16xf32>
      %40 = arith.subf %38, %39 : vector<8x1x16x16xf32>
      %41 = arith.mulf %40, %40 : vector<8x1x16x16xf32>
      %cst_27 = arith.constant dense<0.000000e+00> : vector<16xf32>
      %42 = vector.multi_reduction <add>, %41, %cst_27 [0, 1, 2] : vector<8x1x16x16xf32> to vector<16xf32>
      %c0_28 = arith.constant 0 : index
      %c0_29 = arith.constant 0 : index
      %c0_30 = arith.constant 0 : index
      %43 = vector.load %arg7[%c0_28, %c0_29, %c0_30] : memref<1x1x16xf32, #tpu.memory_space<vmem>>, vector<1x1x16xf32>
      %44 = vector.shape_cast %42 : vector<16xf32> to vector<1x1x16xf32>
      %45 = arith.addf %43, %44 : vector<1x1x16xf32>
      %c0_31 = arith.constant 0 : index
      %c0_32 = arith.constant 0 : index
      %c0_33 = arith.constant 0 : index
      %46 = vector.load %arg7[%c0_31, %c0_32, %c0_33] : memref<1x1x16xf32, #tpu.memory_space<vmem>>, vector<1x1x16xf32>
      tpu.vector_store %arg7[%c0_31, %c0_32, %c0_33], %45 {strides = array<i32>} : memref<1x1x16xf32, #tpu.memory_space<vmem>>, vector<1x1x16xf32>,
    } else {
    }
    return
  }
  func.func @transform_0(%arg0: i32, %arg1: i32) -> (i32, i32) {
    %c1_i32 = arith.constant 1 : i32
    %0 = arith.muli %arg0, %c1_i32 : i32
    %1 = arith.addi %0, %arg1 : i32
    %c0_i32 = arith.constant 0 : i32
    %2 = arith.minsi %1, %c0_i32 : i32
    %c0_i32_0 = arith.constant 0 : i32
    %c0_i32_1 = arith.constant 0 : i32
    return %2, %c0_i32_0 : i32, i32
  }
  func.func @transform_1(%arg0: i32, %arg1: i32) -> (i32, i32) {
    %c1_i32 = arith.constant 1 : i32
    %0 = arith.muli %arg0, %c1_i32 : i32
    %1 = arith.addi %0, %arg1 : i32
    %c0_i32 = arith.constant 0 : i32
    %2 = arith.minsi %1, %c0_i32 : i32
    %c0_i32_0 = arith.constant 0 : i32
    %c0_i32_1 = arith.constant 0 : i32
    return %2, %c0_i32_0 : i32, i32
  }
  func.func @transform_2(%arg0: i32, %arg1: i32) -> (i32, i32, i32, i32) {
    %c1_i32 = arith.constant 1 : i32
    %0 = arith.muli %arg0, %c1_i32 : i32
    %1 = arith.addi %0, %arg1 : i32
    %c0_i32 = arith.constant 0 : i32
    %2 = arith.minsi %1, %c0_i32 : i32
    %c0_i32_0 = arith.constant 0 : i32
    %c0_i32_1 = arith.constant 0 : i32
    %c0_i32_2 = arith.constant 0 : i32
    %c0_i32_3 = arith.constant 0 : i32
    return %2, %c0_i32_0, %c0_i32_1, %c0_i32_2 : i32, i32, i32, i32
  }
  func.func @transform_3(%arg0: i32, %arg1: i32) -> (i32, i32, i32, i32) {
    %c1_i32 = arith.constant 1 : i32
    %0 = arith.muli %arg0, %c1_i32 : i32
    %1 = arith.addi %0, %arg1 : i32
    %c0_i32 = arith.constant 0 : i32
    %2 = arith.minsi %1, %c0_i32 : i32
    %c0_i32_0 = arith.constant 0 : i32
    %c0_i32_1 = arith.constant 0 : i32
    %c0_i32_2 = arith.constant 0 : i32
    %c0_i32_3 = arith.constant 0 : i32
    return %2, %c0_i32_0, %c0_i32_1, %c0_i32_2 : i32, i32, i32, i32
  }
  func.func @transform_4(%arg0: i32, %arg1: i32) -> (i32, i32, i32) {
    %c0_i32 = arith.constant 0 : i32
    %c0_i32_0 = arith.constant 0 : i32
    %c0_i32_1 = arith.constant 0 : i32
    return %arg0, %c0_i32, %c0_i32_0 : i32, i32, i32
  }
  func.func @transform_5(%arg0: i32, %arg1: i32) -> (i32, i32, i32) {
    %c0_i32 = arith.constant 0 : i32
    %c0_i32_0 = arith.constant 0 : i32
    %c0_i32_1 = arith.constant 0 : i32
    return %arg0, %c0_i32, %c0_i32_0 : i32, i32, i32
  }
}

</mosaic_0001>

<bundles_post_ra>
// kernel: tpu_custom_call.1
= control target key start
LH: loop header
LB: loop body
LE: loop exit
PB: predicated region body
PF: predicated region fallthrough
CT: control target
= control target key end

     0   :  { %11 = vsyncpa [#allocation3], 0  ;;  %s554_s0 = inlined_call_operand.hbm [shape: f32[8,10], index: 0, kind: input, shape index: {}]   ;;  %s555_s1 = inlined_call_operand.hbm [shape: f32[8,10], index: 1, kind: input, shape index: {}]   ;;  %s556_s2 = inlined_call_operand.hbm [shape: f32[8,1,16,16], index: 2, kind: input, shape index: {}]   ;;  %s557_s3 = inlined_call_operand.hbm [shape: f32[8,1,16,16], index: 3, kind: input, shape index: {}]   ;;  %s558_s4 = inlined_call_operand.hbm [shape: f32[1,1,1], index: 4, kind: output, shape index: {0}]   ;;  %s559_s5 = inlined_call_operand.hbm [shape: f32[1,1,16], index: 5, kind: output, shape index: {1}]  }
   0x1   :  { %12 = vsyncpa [#allocation6], 0 }
   0x2   :  { %13 = vsyncpa [#allocation9], 0 }
   0x3   :  { %14 = vsyncpa [#allocation4], 0  ;;  %s42_s20 = sshll.u32 %s555_s1, 4  ;;  %s43_s20 = int_to_ptr.hbm [resolvable:$true] %s42_s20 }
   0x4   :  { %15 = vsyncpa [#allocation12], 0  ;;  %s477_s21 = smov [#allocation5]   ;;  %s26_s25 = sshll.u32 %s554_s0, 4  ;;  %s27_s25 = int_to_ptr.hbm [resolvable:$true] %s26_s25 }
   0x5   :  { %s44_s22 = sshll.u32 %s477_s21, 4  ;;  %s478_s26 = smov [#allocation2]   ;;  %s45_s22 = int_to_ptr.vmem [resolvable:$true] %s44_s22 }
   0x6   :  { %47 = dma.hbm_to_vmem [thread:$0]  %s43_s20, 128, %s45_s22, [#allocation6]  }
   0x7   :  { %s28_s27 = sshll.u32 %s478_s26, 4  ;;  %s59_s30 = sshll.u32 %s556_s2, 4  ;;  %s29_s27 = int_to_ptr.vmem [resolvable:$true] %s28_s27  ;;  %s60_s30 = int_to_ptr.hbm [resolvable:$true] %s59_s30 }
   0x8   :  { %31 = dma.hbm_to_vmem [thread:$0]  %s27_s25, 128, %s29_s27, [#allocation3]  }
   0x9   :  { %s479_s1 = smov [#allocation7]   ;;  %s79_s9 = sshll.u32 %s557_s3, 4  ;;  %s80_s9 = int_to_ptr.hbm [resolvable:$true] %s79_s9 }
   0xa   :  { %s61_s6 = sshll.u32 %s479_s1, 4  ;;  %s480_s10 = smov 128   ;;  %s62_s6 = int_to_ptr.vmem [resolvable:$true] %s61_s6 }
   0xb   :  { %s481_s0 = smov 8   ;;  %s482_s11 = smov [#allocation8]  }
   0xc   :  { %67 = dma.hbm_to_vmem [thread:$0]  %s60_s30, 2048, %s62_s6, [#allocation6], %s480_s10, %s480_s10, %s481_s0  }
   0xd   :  { %s81_s12 = sshll.u32 %s482_s11, 4  ;;  %s82_s12 = int_to_ptr.vmem [resolvable:$true] %s81_s12 }
   0xe   :  { %87 = dma.hbm_to_vmem [thread:$0]  %s80_s9, 2048, %s82_s12, [#allocation9], %s480_s10, %s480_s10, %s481_s0  }
   0xf   :  { %467 = dma.done.wait [#allocation3], 128  }
  0x10   :  { %468 = vsyncadd [#allocation3], 4294967168 }
  0x11   :  { %469 = dma.done.wait [#allocation6], 2176  }
  0x12   :  { %470 = vsyncadd [#allocation6], 4294965120 }
  0x13   :  { %471 = dma.done.wait [#allocation9], 2048  }
  0x14   :  { %472 = vsyncadd [#allocation9], 4294965248  ;;  %v133_v0 = vld [vmem:[#allocation2] sm:$0xff]  ;;  %v134_v1 = vld [vmem:[#allocation5] sm:$0xff]  ;;  %vm147_vm0 = vcmask 80896   ;;  %vm122_vm1 = vcmask 0  }
  0x15   :  { %v135_v2 = vsub.f32 0.9, %v133_v0  ;;  %v311_v3 = vadd.f32 -0.1, %v133_v0  ;;  %v141_v4 = vsub.f32 1.0, %v134_v1  ;;  %v483_v14 = vmov 0.0  }
  0x16   :  { %123 = vst.msk [vmem:[#allocation10] sm:$0x1] %vm122_vm1, %v483_v14  ;;  %v162_v15 = vld [vmem:[#allocation7] sm:$0xff]  ;;  %v163_v16 = vld [vmem:[#allocation7 + $0x8] sm:$0xff]  ;;  %v164_v20 = vld [vmem:[#allocation7 + $0x10] sm:$0xff]  ;;  %vm226_vm2 = vcmask 130048  }
  0x17   :  { %v136_v5 = vmax.f32 %v135_v2, 0.0  ;;  %v138_v6 = vmax.f32 %v311_v3, 0.0  ;;  %v142_v7 = vmul.f32 0.5, %v141_v4  ;;  %v178_v17 = vld [vmem:[#allocation8] sm:$0xff]  ;;  %v179_v18 = vld [vmem:[#allocation8 + $0x8] sm:$0xff]  ;;  %v180_v21 = vld [vmem:[#allocation8 + $0x10] sm:$0xff] }
  0x18   :  { %v194_v19 = vsub.f32 %v162_v15, %v178_v17  ;;  %v195_v22 = vsub.f32 %v163_v16, %v179_v18  ;;  %v196_v23 = vsub.f32 %v164_v20, %v180_v21  ;;  %v165_v25 = vld [vmem:[#allocation7 + $0x18] sm:$0xff]  ;;  %v166_v31 = vld [vmem:[#allocation7 + $0x20] sm:$0xff]  ;;  %v167_v38 = vld [vmem:[#allocation7 + $0x28] sm:$0xff]  ;;  %vm124_vm3 = vcmask 122880   ;;  %s484_s2 = smov [#allocation11]   ;;  %s286_s15 = sshll.u32 %s559_s5, 4  ;;  %s287_s15 = int_to_ptr.hbm [resolvable:$true] %s286_s15 }
  0x19   :  { %v139_v8 = vmul.f32 %v136_v5, %v136_v5  ;;  %v143_v9 = vmul.f32 %v138_v6, %v138_v6  ;;  %v181_v26 = vld [vmem:[#allocation8 + $0x18] sm:$0xff]  ;;  %v182_v32 = vld [vmem:[#allocation8 + $0x20] sm:$0xff]  ;;  %v183_v39 = vld [vmem:[#allocation8 + $0x28] sm:$0xff]  ;;  %125 = vst.msk [vmem:[#allocation11] sm:$0x1] %vm124_vm3, %v483_v14  ;;  %s284_s3 = sshll.u32 %s484_s2, 4  ;;  %s285_s3 = int_to_ptr.vmem [resolvable:$true] %s284_s3 }
  0x1a   :  { %v210_v24 = vmul.f32 %v194_v19, %v194_v19  ;;  %v211_v27 = vmul.f32 %v195_v22, %v195_v22  ;;  %v197_v28 = vsub.f32 %v165_v25, %v181_v26  ;;  %v212_v29 = vmul.f32 %v196_v23, %v196_v23  ;;  %v168_v44 = vld [vmem:[#allocation7 + $0x30] sm:$0xff]  ;;  %v169_v50 = vld [vmem:[#allocation7 + $0x38] sm:$0xff]  ;;  %v170_v56 = vld [vmem:[#allocation7 + $0x40] sm:$0xff]  ;;  %s485_s16 = smov [#allocation10]   ;;  %s275_s20 = sshll.u32 %s558_s4, 4  ;;  %s276_s20 = int_to_ptr.hbm [resolvable:$true] %s275_s20 }
  0x1b   :  { %v140_v10 = vmul.f32 %v139_v8, %v134_v1  ;;  %v144_v11 = vmul.f32 %v143_v9, %v142_v7  ;;  %v198_v34 = vsub.f32 %v166_v31, %v182_v32  ;;  %v199_v40 = vsub.f32 %v167_v38, %v183_v39  ;;  %v184_v45 = vld [vmem:[#allocation8 + $0x30] sm:$0xff]  ;;  %v185_v51 = vld [vmem:[#allocation8 + $0x38] sm:$0xff]  ;;  %v186_v57 = vld [vmem:[#allocation8 + $0x40] sm:$0xff]  ;;  %s273_s17 = sshll.u32 %s485_s16, 4  ;;  %s274_s17 = int_to_ptr.vmem [resolvable:$true] %s273_s17 }
  0x1c   :  { %v227_v30 = vsel %vm226_vm2, %v210_v24, 0.0  ;;  %v228_v33 = vsel %vm226_vm2, %v211_v27, 0.0  ;;  %v213_v35 = vmul.f32 %v197_v28, %v197_v28  ;;  %v230_v37 = vsel %vm226_vm2, %v212_v29, 0.0  ;;  %v171_v63 = vld [vmem:[#allocation7 + $0x48] sm:$0xff]  ;;  %v172_v5 = vld [vmem:[#allocation7 + $0x50] sm:$0xff]  ;;  %v174_v20 = vld [vmem:[#allocation7 + $0x60] sm:$0xff] }
  0x1d   :  { %v145_v12 = vadd.f32 %v144_v11, %v140_v10  ;;  %v229_v36 = vadd.f32 %v228_v33, %v227_v30  ;;  %v214_v41 = vmul.f32 %v198_v34, %v198_v34  ;;  %v200_v46 = vsub.f32 %v168_v44, %v184_v45  ;;  %v187_v0 = vld [vmem:[#allocation8 + $0x48] sm:$0xff]  ;;  %v188_v6 = vld [vmem:[#allocation8 + $0x50] sm:$0xff]  ;;  %v190_v21 = vld [vmem:[#allocation8 + $0x60] sm:$0xff] }
  0x1e   :  { %v232_v43 = vsel %vm226_vm2, %v213_v35, 0.0  ;;  %v215_v47 = vmul.f32 %v199_v40, %v199_v40  ;;  %v201_v52 = vsub.f32 %v169_v50, %v185_v51  ;;  %v202_v58 = vsub.f32 %v170_v56, %v186_v57  ;;  %v175_v27 = vld [vmem:[#allocation7 + $0x68] sm:$0xff]  ;;  %v176_v34 = vld [vmem:[#allocation7 + $0x70] sm:$0xff] }
  0x1f   :  { %v148_v13 = vsel %vm147_vm0, %v145_v12, 0.0  ;;  %v231_v42 = vadd.f32 %v230_v37, %v229_v36  ;;  %v234_v49 = vsel %vm226_vm2, %v214_v41, 0.0  ;;  %v216_v53 = vmul.f32 %v200_v46, %v200_v46  ;;  %v173_v12 = vld [vmem:[#allocation7 + $0x58] sm:$0xff]  ;;  %v191_v28 = vld [vmem:[#allocation8 + $0x68] sm:$0xff]  ;;  %v192_v35 = vld [vmem:[#allocation8 + $0x70] sm:$0xff] }
  0x20   :  { %149 = vadd.xlane.f32.xlu0 %v148_v13  ;;  %v236_v55 = vsel %vm226_vm2, %v215_v47, 0.0  ;;  %v217_v59 = vmul.f32 %v201_v52, %v201_v52  ;;  %v203_v2 = vsub.f32 %v171_v63, %v187_v0  ;;  %v218_v3 = vmul.f32 %v202_v58, %v202_v58  ;;  %v189_v13 = vld [vmem:[#allocation8 + $0x58] sm:$0xff] }
  0x21   :  { %v233_v48 = vadd.f32 %v232_v43, %v231_v42  ;;  %v238_v61 = vsel %vm226_vm2, %v216_v53, 0.0  ;;  %v204_v9 = vsub.f32 %v172_v5, %v188_v6  ;;  %v205_v17 = vsub.f32 %v173_v12, %v189_v13  ;;  %v177_v41 = vld [vmem:[#allocation7 + $0x78] sm:$0xff] }
  0x22   :  { %v240_v7 = vsel %vm226_vm2, %v217_v59, 0.0  ;;  %v219_v10 = vmul.f32 %v203_v2, %v203_v2  ;;  %v242_v15 = vsel %vm226_vm2, %v218_v3, 0.0  ;;  %v206_v24 = vsub.f32 %v174_v20, %v190_v21  ;;  %v193_v42 = vld [vmem:[#allocation8 + $0x78] sm:$0xff] }
  0x23   :  { %v235_v54 = vadd.f32 %v234_v49, %v233_v48  ;;  %v220_v18 = vmul.f32 %v204_v9, %v204_v9  ;;  %v221_v25 = vmul.f32 %v205_v17, %v205_v17  ;;  %v207_v31 = vsub.f32 %v175_v27, %v191_v28 }
  0x24   :  { %v244_v22 = vsel %vm226_vm2, %v219_v10, 0.0  ;;  %v222_v32 = vmul.f32 %v206_v24, %v206_v24  ;;  %v208_v38 = vsub.f32 %v176_v34, %v192_v35  ;;  %v209_v44 = vsub.f32 %v177_v41, %v193_v42 }
  0x25   :  { %v237_v60 = vadd.f32 %v236_v55, %v235_v54  ;;  %v246_v29 = vsel %vm226_vm2, %v220_v18, 0.0  ;;  %v248_v36 = vsel %vm226_vm2, %v221_v25, 0.0  ;;  %v223_v39 = vmul.f32 %v207_v31, %v207_v31 }
  0x26   :  { %v250_v43 = vsel %vm226_vm2, %v222_v32, 0.0  ;;  %v224_v45 = vmul.f32 %v208_v38, %v208_v38  ;;  %v225_v48 = vmul.f32 %v209_v44, %v209_v44 }
  0x27   :  { %v239_v4 = vadd.f32 %v238_v61, %v237_v60  ;;  %v252_v47 = vsel %vm226_vm2, %v223_v39, 0.0  ;;  %v264_v60 = vld [vmem:[#allocation11] sm:$0x1] }
  0x28   :  { %v254_v50 = vsel %vm226_vm2, %v224_v45, 0.0  ;;  %v256_v52 = vsel %vm226_vm2, %v225_v48, 0.0 }
  0x29   :  { %v241_v11 = vadd.f32 %v240_v7, %v239_v4 }
  0x2b   :  { %v243_v19 = vadd.f32 %v242_v15, %v241_v11 }
  0x2d   :  { %v245_v26 = vadd.f32 %v244_v22, %v243_v19 }
  0x2f   :  { %v247_v33 = vadd.f32 %v246_v29, %v245_v26 }
  0x31   :  { %v249_v40 = vadd.f32 %v248_v36, %v247_v33 }
  0x33   :  { %v251_v46 = vadd.f32 %v250_v43, %v249_v40 }
  0x35   :  { %v253_v49 = vadd.f32 %v252_v47, %v251_v46 }
  0x37   :  { %v255_v51 = vadd.f32 %v254_v50, %v253_v49 }
  0x39   :  { %v257_v53 = vadd.f32 %v256_v52, %v255_v51 }
  0x3b   :  { %v258_v54 = vrot.slane %v257_v53, 4 }
  0x3d   :  { %v259_v55 = vadd.f32 %v258_v54, %v257_v53 }
  0x3f   :  { %v260_v56 = vrot.slane %v259_v55, 2 }
  0x41   :  { %v261_v57 = vadd.f32 %v260_v56, %v259_v55 }
  0x43   :  { %v262_v58 = vrot.slane %v261_v57, 1 }
  0x45   :  { %v263_v59 = vadd.f32 %v262_v58, %v261_v57 }
  0x47   :  { %v265_v61 = vadd.f32 %v264_v60, %v263_v59 }
  0x49   :  { %267 = vst.msk [vmem:[#allocation11] sm:$0x1] %vm124_vm3, %v265_v61 }
  0x4a   :  { %289 = dma.vmem_to_hbm [thread:$0]  %s285_s3, 16, %s287_s15, [#allocation12]  }
  0x93   :  { %v150_v62 = vpop.xlane.xlu0 %149 }
  0x94   :  { %v151_v1 = vrot.slane %v150_v62, 4 }
  0x96   :  { %v152_v8 = vadd.f32 %v151_v1, %v150_v62  ;;  %v146_v62 = vld [vmem:[#allocation10] sm:$0x1] }
  0x98   :  { %v153_v16 = vrot.slane %v152_v8, 2 }
  0x9a   :  { %v154_v23 = vadd.f32 %v153_v16, %v152_v8 }
  0x9c   :  { %v155_v30 = vrot.slane %v154_v23, 1 }
  0x9e   :  { %v156_v37 = vadd.f32 %v155_v30, %v154_v23 }
  0xa0   :  { %312 = vpush %v156_v37 }
  0xd1   :  { %s313_s21 = spop %312 }
  0xd2   :  { %v158_v14 = vstv %s313_s21 }
  0xd3   :  { %v159_v63 = vadd.f32 %v158_v14, %v146_v62 }
  0xd5   :  { %161 = vst.msk [vmem:[#allocation10] sm:$0x1] %vm122_vm1, %v159_v63 }
  0xd6   :  { %278 = dma.vmem_to_hbm [thread:$0]  %s274_s17, 16, %s276_s20, [#allocation4]  }
  0xd7   :  { %473 = dma.done.wait [#allocation4], 16  }
  0xd8   :  { %474 = vsyncadd [#allocation4], 4294967280 }
  0xd9   :  { %475 = dma.done.wait [#allocation12], 16  }
  0xda   :  { %476 = vsyncadd [#allocation12], 4294967280 }
  0xdb   :  { %298 = vsyncpa [#allocation3], 1 }
  0xdc   :  { %299 = vsyncpa [#allocation6], 1 }
  0xdd   :  { %300 = vsyncpa [#allocation9], 1 }
  0xde   :  { %301 = vsyncpa [#allocation4], 1 }
  0xdf   :  { %302 = vsyncpa [#allocation12], 1 }

</bundles_post_ra>
